<compile_context>
chip_gen: v5e
topology: v5e:2x2
jax: 0.10.0
libtpu: 0.0.40
codegen_flags: <defaults>
</compile_context>

<pallas_src>
import functools

import jax
import jax.numpy as jnp
from jax.experimental import pallas as pl
from jax.experimental.pallas import tpu as pltpu

_NEG = -1e30  # "minus infinity" for masked (padded) class columns


def _round_up(x, m):
    return ((x + m - 1) // m) * m


def _choose_tile_n(n_rows, c_pad, itemsize):
    """Largest row tile fitting a conservative VMEM budget (all generations)."""
    budget = 20 * 1024 * 1024                 # ~20 MiB for tiles + temporaries
    # 2x double-buffered input rows + ~4 f32 full-tile temporaries per row.
    bytes_per_row = c_pad * (2 * itemsize + 4 * 4)
    tile = budget // max(bytes_per_row, 1)
    tile = max(8, min(int(tile), 1024))
    tile = (tile // 8) * 8
    # Don't tile wider than the (padded) batch itself.
    tile = min(tile, _round_up(n_rows, 8))
    return int(tile)


def _label_smoothing_kernel(pred_ref, tgt_ref, out_ref, *,
                            confidence, smooth_val, n_classes):
    x = pred_ref[...].astype(jnp.float32)                    # (tn, C_pad)
    tn, c_pad = x.shape
    col = jax.lax.broadcasted_iota(jnp.int32, (tn, c_pad), 1)

    if n_classes == c_pad:
        xm = x
        sum_logits = jnp.sum(x, axis=-1, keepdims=True)
    else:
        valid = col < n_classes                              # mask pad columns
        xm = jnp.where(valid, x, _NEG)
        sum_logits = jnp.sum(jnp.where(valid, x, 0.0), axis=-1, keepdims=True)

    # log-sum-exp over real classes (padded columns contribute exp() == 0).
    m = jnp.max(xm, axis=-1, keepdims=True)
    lse = jnp.log(jnp.sum(jnp.exp(xm - m), axis=-1, keepdims=True))

    # logit at the target class (one masked reduce instead of a one-hot tile).
    tgt = tgt_ref[...]                                       # (tn, 1) int32
    logit_t = jnp.sum(jnp.where(col == tgt, x, 0.0), axis=-1, keepdims=True)

    # sum_c true_dist[c] == confidence + (C-1)*smooth_val == 1, hence:
    #   row_loss = (m + lse) - [smooth*sum(logits) + (conf - smooth)*logit_t]
    row_loss = (m + lse) - (smooth_val * sum_logits
                            + (confidence - smooth_val) * logit_t)
    out_ref[...] = row_loss.astype(out_ref.dtype)


def label_smoothing_loss(pred, target, *, classes, smoothing=0.0, tile_n=None):
    """Pallas equivalent of LabelSmoothingLoss(classes, smoothing)(pred, target)."""
    N, C = pred.shape
    assert C == classes
    confidence = 1.0 - smoothing
    smooth_val = (smoothing / (classes - 1)) if classes > 1 else 0.0

    c_pad = _round_up(C, 128)                     # lane-dense class dimension
    itemsize = jnp.dtype(pred.dtype).itemsize     # keep HBM dtype (bf16 ok)
    if tile_n is None:
        tile_n = _choose_tile_n(N, c_pad, itemsize)
    tile_n = max(8, (int(tile_n) // 8) * 8)
    n_pad = _round_up(N, tile_n)                  # remainder rows -> padded

    pred_p = pred
    if c_pad != C or n_pad != N:
        pred_p = jnp.pad(pred, ((0, n_pad - N), (0, c_pad - C)))
    tgt_p = target.astype(jnp.int32).reshape(N, 1)
    if n_pad != N:
        tgt_p = jnp.pad(tgt_p, ((0, n_pad - N), (0, 0)))

    kernel = functools.partial(
        _label_smoothing_kernel,
        confidence=float(confidence),
        smooth_val=float(smooth_val),
        n_classes=C,
    )

    per_row = pl.pallas_call(
        kernel,
        out_shape=jax.ShapeDtypeStruct((n_pad, 1), jnp.float32),
        grid_spec=pltpu.PrefetchScalarGridSpec(
            num_scalar_prefetch=0,
            grid=(n_pad // tile_n,),
            in_specs=[
                pl.BlockSpec((tile_n, c_pad), lambda i: (i, 0)),  # pred rows
                pl.BlockSpec((tile_n, 1), lambda i: (i, 0)),      # targets
            ],
            out_specs=pl.BlockSpec((tile_n, 1), lambda i: (i, 0)),  # row losses
        ),
        compiler_params=pltpu.CompilerParams(
            dimension_semantics=("parallel",),        # independent row blocks
            vmem_limit_bytes=48 * 1024 * 1024),       # > default on v5e/v6e/v7x
    )(pred_p, tgt_p)

    # Final mean over the real rows in plain JAX (tree-reduced, precise).
    return jnp.sum(per_row[:N, 0]) / jnp.float32(N)


def _reference(pred, target, classes, smoothing):
    logp = jax.nn.log_softmax(pred.astype(jnp.float32), axis=-1)
    true_dist = jnp.full_like(logp, smoothing / (classes - 1))
    true_dist = true_dist.at[jnp.arange(pred.shape[0]), target].set(1.0 - smoothing)
    return jnp.mean(jnp.sum(-true_dist * logp, axis=-1))


if __name__ == "__main__":
    key = jax.random.PRNGKey(0)

    # Case 1: the small demo shape (batch=16, classes=32), smoothing=0.1.
    N, C = 16, 32
    smoothing = 0.1
    k1, k2, k3, k4 = jax.random.split(key, 4)
    pred = jax.random.normal(k1, (N, C), dtype=jnp.float32)
    target = jax.random.randint(k2, (N,), 0, C, dtype=jnp.int32)

    loss = label_smoothing_loss(pred, target, classes=C, smoothing=smoothing)
    loss = jax.block_until_ready(loss)
    ref = _reference(pred, target, C, smoothing)
    assert jnp.allclose(loss, ref, atol=1e-4, rtol=1e-4), (loss, ref)

    # Case 2: ragged shapes exercising both the class-dim (lane) padding and
    # the batch-dim (remainder) padding paths.
    N2, C2 = 13, 37
    smoothing2 = 0.2
    pred2 = jax.random.normal(k3, (N2, C2), dtype=jnp.float32)
    target2 = jax.random.randint(k4, (N2,), 0, C2, dtype=jnp.int32)

    loss2 = label_smoothing_loss(pred2, target2, classes=C2, smoothing=smoothing2)
    loss2 = jax.block_until_ready(loss2)
    ref2 = _reference(pred2, target2, C2, smoothing2)
    assert jnp.allclose(loss2, ref2, atol=1e-4, rtol=1e-4), (loss2, ref2)

    print("KERNEL_OK")
</pallas_src>

<mosaic_0001>
module attributes {stable_mosaic.version = 11 : i64} {
  func.func @_label_smoothing_kernel(%arg0: i32, %arg1: memref<16x128xf32, #tpu.memory_space<vmem>>, %arg2: memref<16x1xi32, #tpu.memory_space<vmem>>, %arg3: memref<16x1xf32, #tpu.memory_space<vmem>>) attributes {dimension_semantics = [#tpu.dimension_semantics<parallel>], iteration_bounds = array<i64: 1>, scalar_prefetch = 0 : i64, scratch_operands = 0 : i64, tpu.core_type = #tpu.core_type<tc>, window_params = [{transform_indices = @transform_0, window_bounds = array<i64: 16, 128>}, {transform_indices = @transform_1, window_bounds = array<i64: 16, 1>}, {transform_indices = @transform_2, window_bounds = array<i64: 16, 1>}]} {
    %c0 = arith.constant 0 : index
    %c0_0 = arith.constant 0 : index
    %0 = vector.load %arg1[%c0, %c0_0] : memref<16x128xf32, #tpu.memory_space<vmem>>, vector<16x128xf32>
    %1 = tpu.iota {dimensions = array<i32: 1>} : vector<16x128xi32>
    %c32_i32 = arith.constant 32 : i32
    %2 = vector.broadcast %c32_i32 : i32 to vector<16x128xi32>
    %3 = arith.cmpi slt, %1, %2 : vector<16x128xi32>
    %cst = arith.constant -1.000000e+30 : f32
    %4 = vector.broadcast %cst : f32 to vector<16x128xf32>
    %5 = arith.select %3, %0, %4 : vector<16x128xi1>, vector<16x128xf32>
    %cst_1 = arith.constant 0.000000e+00 : f32
    %6 = vector.broadcast %cst_1 : f32 to vector<16x128xf32>
    %7 = arith.select %3, %0, %6 : vector<16x128xi1>, vector<16x128xf32>
    %cst_2 = arith.constant dense<0.000000e+00> : vector<16xf32>
    %8 = vector.multi_reduction <add>, %7, %cst_2 [1] : vector<16x128xf32> to vector<16xf32>
    %9 = vector.shape_cast %8 : vector<16xf32> to vector<16x1xf32>
    %cst_3 = arith.constant dense<0xFF800000> : vector<16xf32>
    %10 = vector.multi_reduction <maximumf>, %5, %cst_3 [1] : vector<16x128xf32> to vector<16xf32>
    %11 = vector.shape_cast %10 : vector<16xf32> to vector<16x1xf32>
    %12 = vector.broadcast %11 : vector<16x1xf32> to vector<16x128xf32>
    %13 = arith.subf %5, %12 : vector<16x128xf32>
    %14 = math.exp %13 : vector<16x128xf32>
    %cst_4 = arith.constant dense<0.000000e+00> : vector<16xf32>
    %15 = vector.multi_reduction <add>, %14, %cst_4 [1] : vector<16x128xf32> to vector<16xf32>
    %16 = vector.shape_cast %15 : vector<16xf32> to vector<16x1xf32>
    %17 = math.log %16 : vector<16x1xf32>
    %c0_5 = arith.constant 0 : index
    %c0_6 = arith.constant 0 : index
    %18 = vector.load %arg2[%c0_5, %c0_6] : memref<16x1xi32, #tpu.memory_space<vmem>>, vector<16x1xi32>
    %19 = vector.broadcast %18 : vector<16x1xi32> to vector<16x128xi32>
    %20 = arith.cmpi eq, %1, %19 : vector<16x128xi32>
    %cst_7 = arith.constant 0.000000e+00 : f32
    %21 = vector.broadcast %cst_7 : f32 to vector<16x128xf32>
    %22 = arith.select %20, %0, %21 : vector<16x128xi1>, vector<16x128xf32>
    %cst_8 = arith.constant dense<0.000000e+00> : vector<16xf32>
    %23 = vector.multi_reduction <add>, %22, %cst_8 [1] : vector<16x128xf32> to vector<16xf32>
    %24 = vector.shape_cast %23 : vector<16xf32> to vector<16x1xf32>
    %25 = arith.addf %11, %17 : vector<16x1xf32>
    %cst_9 = arith.constant 0.0032258064 : f32
    %26 = vector.broadcast %cst_9 : f32 to vector<16x1xf32>
    %27 = arith.mulf %26, %9 : vector<16x1xf32>
    %cst_10 = arith.constant 0.896774172 : f32
    %28 = vector.broadcast %cst_10 : f32 to vector<16x1xf32>
    %29 = arith.mulf %28, %24 : vector<16x1xf32>
    %30 = arith.addf %27, %29 : vector<16x1xf32>
    %31 = arith.subf %25, %30 : vector<16x1xf32>
    %c0_11 = arith.constant 0 : index
    %c0_12 = arith.constant 0 : index
    %32 = vector.load %arg3[%c0_11, %c0_12] : memref<16x1xf32, #tpu.memory_space<vmem>>, vector<16x1xf32>
    tpu.vector_store %arg3[%c0_11, %c0_12], %31 {strides = array<i32>} : memref<16x1xf32, #tpu.memory_space<vmem>>, vector<16x1xf32>,
    return
  }
  func.func @transform_0(%arg0: i32) -> (i32, i32) {
    %c0_i32 = arith.constant 0 : i32
    %c0_i32_0 = arith.constant 0 : i32
    return %arg0, %c0_i32 : i32, i32
  }
  func.func @transform_1(%arg0: i32) -> (i32, i32) {
    %c0_i32 = arith.constant 0 : i32
    %c0_i32_0 = arith.constant 0 : i32
    return %arg0, %c0_i32 : i32, i32
  }
  func.func @transform_2(%arg0: i32) -> (i32, i32) {
    %c0_i32 = arith.constant 0 : i32
    %c0_i32_0 = arith.constant 0 : i32
    return %arg0, %c0_i32 : i32, i32
  }
}

</mosaic_0001>

<bundles_post_ra>
// kernel: tpu_custom_call.1
= control target key start
LH: loop header
LB: loop body
LE: loop exit
PB: predicated region body
PF: predicated region fallthrough
CT: control target
= control target key end

     0   :  { %v13_v0 = vlaneseq  ;;  %v86_v1 = vmov 0   ;;  %vm68_vm3 = vcmask 7168   ;;  %s120_s0 = inlined_call_operand.vmem [shape: f32[16,128], index: 0, kind: input, shape index: {}]   ;;  %s121_s1 = inlined_call_operand.vmem [shape: s32[16,1], index: 1, kind: input, shape index: {}]   ;;  %s122_s2 = inlined_call_operand.vmem [shape: f32[16,1], index: 2, kind: output, shape index: {}]  }
   0x1   :  { %76 = vset.pattern.permute.xlu1 %v86_v1  ;;  %v42_v2 = vld [vmem:[%s121_s1] sm:$0xff]  ;;  %77 = vset.pattern.permute.xlu0 %v86_v1  ;;  %v43_v6 = vld [vmem:[%s121_s1 + $0x8] sm:$0xff] }
   0x2   :  { %v11_v3 = vld [vmem:[%s120_s0] sm:$0xff]  ;;  %v14_v4 = vand.u32 127, %v13_v0  ;;  %45 = vperm.xlu1 %76, %v42_v2   ;;  %v12_v7 = vld [vmem:[%s120_s0 + $0x8] sm:$0xff] }
   0x4   :  { %vm15_vm0 = vcmp.lt.s32.totalorder %v14_v4, 32 }
   0x5   :  { %v16_v5 = vsel %vm15_vm0, %v11_v3, -1e+30  ;;  %v17_v8 = vsel %vm15_vm0, %v12_v7, -1e+30  ;;  %v18_v9 = vsel %vm15_vm0, %v11_v3, 0.0  ;;  %v19_v10 = vsel %vm15_vm0, %v12_v7, 0.0 }
   0x6   :  { %24 = vmax.xlane.f32.xlu0 %v16_v5 }
   0xa   :  { %48 = vperm.xlu1 %76, %v43_v6  }
   0xe   :  { %26 = vmax.xlane.f32.xlu0 %v17_v8 }
  0x16   :  { %20 = vadd.xlane.f32.xlu0 %v18_v9 }
  0x34   :  { %22 = vadd.xlane.f32.xlu1 %v19_v10 }
  0x74   :  { %v46_v11 = vpop.permute.xlu1 %45 }
  0x75   :  { %vm50_vm2 = vcmp.eq.s32.totalorder %v14_v4, %v46_v11 }
  0x76   :  { %v52_v22 = vsel %vm50_vm2, %v11_v3, 0.0 }
  0x79   :  { %v25_v12 = vpop.xlane.xlu0 %24 }
  0x7a   :  { %v28_v13 = vsub.f32 %v16_v5, %v25_v12 }
  0x7c   :  { %v30_v14 = vmul.f32 1.442695, %v28_v13  ;;  %v49_v15 = vpop.permute.xlu1 %48 }
  0x7d   :  { %vm51_vm1 = vcmp.eq.s32.totalorder %v14_v4, %v49_v15 }
  0x7e   :  { %78 = vpow2.f32 %v30_v14  ;;  %v53_v16 = vsel %vm51_vm1, %v12_v7, 0.0 }
  0x7f   :  { %56 = vadd.xlane.f32.xlu0 %v53_v16 }
  0x81   :  { %v27_v17 = vpop.xlane.xlu0 %26 }
  0x82   :  { %v29_v18 = vsub.f32 %v17_v8, %v27_v17 }
  0x84   :  { %v79_v19 = vpop.eup %78  ;;  %v32_v20 = vmul.f32 1.442695, %v29_v18 }
  0x85   :  { %34 = vadd.xlane.f32.xlu2 %v79_v19 }
  0x86   :  { %80 = vpow2.f32 %v32_v20 }
  0x89   :  { %v21_v24 = vpop.xlane.xlu0 %20 }
  0x8a   :  { %v60_v35 = vmul.f32 0.0032258064, %v21_v24 }
  0x8c   :  { %v81_v21 = vpop.eup %80 }
  0x8d   :  { %36 = vadd.xlane.f32.xlu2 %v81_v21 }
  0x95   :  { %54 = vadd.xlane.f32.xlu2 %v52_v22 }
  0xa7   :  { %v23_v26 = vpop.xlane.xlu1 %22 }
  0xa8   :  { %v61_v29 = vmul.f32 0.0032258064, %v23_v26 }
  0xf2   :  { %v57_v27 = vpop.xlane.xlu0 %56 }
  0xf3   :  { %v63_v30 = vmul.f32 0.8967742, %v57_v27 }
  0xf5   :  { %v65_v38 = vadd.f32 %v63_v30, %v61_v29 }
  0xf8   :  { %v35_v23 = vpop.xlane.xlu2 %34 }
  0xf9   :  { %82 = vlog2.f32 %v35_v23 }
  0xff   :  { %v83_v28 = vpop.eup %82 }
 0x100   :  { %v37_v25 = vpop.xlane.xlu2 %36  ;;  %v39_v32 = vmul.f32 0.6931472, %v83_v28 }
 0x101   :  { %84 = vlog2.f32 %v37_v25 }
 0x102   :  { %v58_v39 = vadd.f32 %v39_v32, %v25_v12 }
 0x107   :  { %v85_v31 = vpop.eup %84 }
 0x108   :  { %v41_v33 = vmul.f32 0.6931472, %v85_v31  ;;  %v55_v34 = vpop.xlane.xlu2 %54 }
 0x109   :  { %v62_v36 = vmul.f32 0.8967742, %v55_v34 }
 0x10a   :  { %v59_v37 = vadd.f32 %v41_v33, %v27_v17 }
 0x10b   :  { %v64_v40 = vadd.f32 %v62_v36, %v60_v35 }
 0x10c   :  { %v67_v41 = vsub.f32 %v59_v37, %v65_v38 }
 0x10d   :  { %v66_v42 = vsub.f32 %v58_v39, %v64_v40 }
 0x10e   :  { %70 = vst.msk [vmem:[%s122_s2 + $0x8] sm:$0xff] %vm68_vm3, %v67_v41 }
 0x10f   :  { %69 = vst.msk [vmem:[%s122_s2] sm:$0xff] %vm68_vm3, %v66_v42 }

</bundles_post_ra>
